<compile_context>
chip_gen: v7x
topology: tpu7x:2x2x1
jax: 0.10.0
libtpu: 0.0.40
codegen_flags: <defaults>
</compile_context>

<pallas_src>
import jax
import jax.numpy as jnp
from jax.experimental import pallas as pl
from jax.experimental.pallas import tpu as pltpu

# ----------------------------- model dimensions ------------------------------
IN_CH = 4
FEAT_DIM = 32        # feat_dim = in_features of the backbone's last Linear
NUM_CLASSES = 10
H = W = 16
HW = H * W
LANE = 128
GROUPS = LANE // FEAT_DIM          # 4 spatial sub-positions packed along lanes

# packed-lane layout of the single [B, 128] output slab
OUT_OFF = 0          # lanes [0, NUM_CLASSES)   -> classifier logits
FEAT_OFF = 32        # lanes [32, 64)           -> pooled feature (VPU/XLU path)
PROJ_OFF = 64        # lanes [64, 96)           -> proj_head output
HID_OFF = 96         # lanes [96, 128)          -> proj hidden pre-act (ignored)

TILE_B_MAX = 128     # 128 * 64 * 128 * 4B = 4 MiB act tile; x2 buffers = 8 MiB
                     # -> safe under v5e's 16 MiB scoped-VMEM default too.


def _round_up(x, m):
    return ((x + m - 1) // m) * m


# ------------------------------- Pallas kernel --------------------------------
def fused_wrapper_kernel(act_ref, convb_ref, w1_ref, b1_ref, w2_ref, b2_ref,
                         fmask_ref, slab_ref):
    """Fused backbone-tail (bias+ReLU+pool) + classifier + proj_head.

    act_ref   : [TB, HW/4, 128]  conv output (pre-bias), channels packed 4x/lane
    convb_ref : [1, 128]         conv bias tiled 4x along lanes
    w1_ref    : [128, 128]       4x row-tiled fused stage-1 weight:
                                   cols [0,10)=Wfc/HW, cols [96,128)=W1/HW
    b1_ref    : [1, 128]         cols [0,10)=bfc, cols [96,128)=b1
    w2_ref    : [128, 128]       rows [96,128) x cols [64,96) = W2, else 0
    b2_ref    : [1, 128]         cols [64,96) = b2, else 0
    fmask_ref : [1, 128]         cols [32,64) = 1/HW, else 0
    slab_ref  : [TB, 128]        lane-dense packed output (see layout above)
    """
    # --- backbone tail: conv bias + ReLU on fully-packed vregs (VPU),
    #     then sublane sum over the HW/4 spatial rows (XLU). ---
    a = act_ref[...].astype(jnp.float32)                       # [TB, 64, 128]
    y = jnp.maximum(a + convb_ref[...], 0.0)
    s = jnp.sum(y, axis=1)                                      # [TB, 128]

    # --- exact pooled feature: fold the 4 channel groups with two XLU rolls.
    #     g[:, i] == sum_k s[:, (i mod 32) + 32k]  for every lane i. ---
    g = s + pltpu.roll(s, shift=2 * FEAT_DIM, axis=1)           # shift 64
    g = g + pltpu.roll(g, shift=FEAT_DIM, axis=1)               # shift 32

    # --- stage 1: one lane-full matmul. The 4x row-tiled weight makes the MXU
    #     do the group fold for free; 1/HW is pre-folded into the weights. ---
    z = (jnp.dot(s, w1_ref[...], preferred_element_type=jnp.float32)
         + b1_ref[...])                                         # [TB, 128]

    # --- stage 2: proj = relu(h) @ W2 + b2 via the padded [128,128] weight
    #     (only rows [96,128) are nonzero, so only the hidden lanes matter). ---
    p = (jnp.dot(jnp.maximum(z, 0.0), w2_ref[...],
                 preferred_element_type=jnp.float32)
         + b2_ref[...])                                         # [TB, 128]

    # Single unmasked lane-dense store:
    #   lanes [0,10) logits (z), [32,64) feat (g/HW), [64,96) proj (p).
    slab_ref[...] = z + g * fmask_ref[...] + p


# ------------------------------ kernel launcher --------------------------------
def fused_heads(act4, packed, tile_b=TILE_B_MAX):
    """act4: [B, HW/4, 128] conv activations (channels innermost, 4x packed)."""
    B = act4.shape[0]
    tb = min(tile_b, _round_up(B, 8))           # (8,128) tiling of the output
    b_pad = _round_up(B, tb)
    if b_pad != B:
        act4 = jnp.pad(act4, ((0, b_pad - B), (0, 0), (0, 0)))
    n_tiles = b_pad // tb

    res2d = lambda i: (0, 0)                    # weights stay resident in VMEM

    act_bytes = act4.size * act4.dtype.itemsize
    param_bytes = 4 * (2 * LANE * LANE + 4 * LANE)
    cost = pl.CostEstimate(
        flops=(3 * b_pad * (HW // GROUPS) * LANE     # bias + relu + sublane sum
               + 4 * b_pad * LANE                     # roll folds
               + 4 * b_pad * LANE * LANE              # two matmuls
               + 5 * b_pad * LANE),                   # biases / relu / epilogue
        transcendentals=0,
        bytes_accessed=act_bytes + param_bytes + 4 * b_pad * LANE)

    slab = pl.pallas_call(
        fused_wrapper_kernel,
        out_shape=jax.ShapeDtypeStruct((b_pad, LANE), jnp.float32),
        grid=(n_tiles,),
        in_specs=[
            pl.BlockSpec((tb, HW // GROUPS, LANE), lambda i: (i, 0, 0)),  # act
            pl.BlockSpec((1, LANE), res2d),        # conv bias (4x tiled)
            pl.BlockSpec((LANE, LANE), res2d),     # fused stage-1 weight
            pl.BlockSpec((1, LANE), res2d),        # fused stage-1 bias
            pl.BlockSpec((LANE, LANE), res2d),     # padded W2
            pl.BlockSpec((1, LANE), res2d),        # padded b2
            pl.BlockSpec((1, LANE), res2d),        # feat lane mask (1/HW)
        ],
        out_specs=pl.BlockSpec((tb, LANE), lambda i: (i, 0)),
        compiler_params=pltpu.CompilerParams(
            dimension_semantics=("parallel",)),
        cost_estimate=cost,
    )(act4, packed["conv_b4"], packed["w1_fused"], packed["b1_fused"],
      packed["w2_pad"], packed["b2_pad"], packed["feat_mask"])
    return slab


# ------------------------------ wrapper.forward -------------------------------
def wrapper_forward(x, packed, bb_grad=True, act_dtype=jnp.float32,
                    tile_b=TILE_B_MAX):
    """x: [B, IN_CH, H, W] (NCHW). Returns (out, proj_head(feat), feat)."""
    # The injected backbone's conv stays in XLA; its bias+ReLU+pool and the
    # wrapper's heads are fused into the Pallas kernel.
    # TODO(synk): fuse the 3x3 conv as an im2col matmul inside the kernel (or
    # run act_dtype=jnp.bfloat16) to remove/halve the act HBM round-trip.
    xh = jnp.transpose(x, (0, 2, 3, 1))                      # NCHW -> NHWC
    act = jax.lax.conv_general_dilated(
        xh, packed["conv_w"], window_strides=(1, 1), padding="SAME",
        dimension_numbers=("NHWC", "HWIO", "NHWC"))          # [B, H, W, C]
    B = act.shape[0]
    act4 = act.reshape(B, HW // GROUPS, GROUPS * FEAT_DIM).astype(act_dtype)

    slab = fused_heads(act4, packed, tile_b=tile_b)
    out = slab[:B, OUT_OFF:OUT_OFF + NUM_CLASSES]
    feat = slab[:B, FEAT_OFF:FEAT_OFF + FEAT_DIM]
    proj = slab[:B, PROJ_OFF:PROJ_OFF + FEAT_DIM]

    # TODO(synk): pallas_call has no autodiff rule; for training, wrap
    # fused_heads in a jax.custom_vjp (backward = three tiny matmuls) and
    # implement feat.detach() (bb_grad=False) there. Forward values are
    # identical either way.
    if not bb_grad:
        feat = jax.lax.stop_gradient(feat)
    return out, proj, feat


# -------------------------------- parameters ----------------------------------
def init_params(key):
    ks = jax.random.split(key, 5)

    def lin(k, fan_in, fan_out):
        bound = 1.0 / jnp.sqrt(fan_in)
        kw, kb = jax.random.split(k)
        w = jax.random.uniform(kw, (fan_in, fan_out), jnp.float32, -bound, bound)
        b = jax.random.uniform(kb, (fan_out,), jnp.float32, -bound, bound)
        return w, b

    conv_fan_in = IN_CH * 3 * 3
    cbound = 1.0 / jnp.sqrt(conv_fan_in)
    conv_w = jax.random.uniform(ks[0], (3, 3, IN_CH, FEAT_DIM), jnp.float32,
                                -cbound, cbound)
    conv_b = jax.random.uniform(ks[1], (FEAT_DIM,), jnp.float32, -cbound, cbound)

    fc_w, fc_b = lin(ks[2], FEAT_DIM, NUM_CLASSES)   # backbone last Linear
    p1_w, p1_b = lin(ks[3], FEAT_DIM, FEAT_DIM)      # proj_head Linear 1
    p2_w, p2_b = lin(ks[4], FEAT_DIM, FEAT_DIM)      # proj_head Linear 2

    return dict(conv_w=conv_w, conv_b=conv_b, fc_w=fc_w, fc_b=fc_b,
                p1_w=p1_w, p1_b=p1_b, p2_w=p2_w, p2_b=p2_b)


def pack_params(p):
    """One-time packing into lane-dense fused operands (outside the kernel)."""
    inv_hw = 1.0 / float(HW)

    # stage-1 fused weight over a single 32-channel group, 1/HW pre-folded.
    w1 = jnp.zeros((FEAT_DIM, LANE), jnp.float32)
    w1 = w1.at[:, OUT_OFF:OUT_OFF + NUM_CLASSES].set(p["fc_w"] * inv_hw)
    w1 = w1.at[:, HID_OFF:HID_OFF + FEAT_DIM].set(p["p1_w"] * inv_hw)
    # tile 4x along rows so the MXU folds the 4 channel groups of the lane-
    # packed sublane sums: s @ tile(w1, 4) == channel_sum @ w1.
    w1_fused = jnp.tile(w1, (GROUPS, 1))                         # [128, 128]

    b1_fused = jnp.zeros((1, LANE), jnp.float32)
    b1_fused = b1_fused.at[0, OUT_OFF:OUT_OFF + NUM_CLASSES].set(p["fc_b"])
    b1_fused = b1_fused.at[0, HID_OFF:HID_OFF + FEAT_DIM].set(p["p1_b"])

    w2_pad = jnp.zeros((LANE, LANE), jnp.float32)
    w2_pad = w2_pad.at[HID_OFF:HID_OFF + FEAT_DIM,
                       PROJ_OFF:PROJ_OFF + FEAT_DIM].set(p["p2_w"])
    b2_pad = jnp.zeros((1, LANE), jnp.float32)
    b2_pad = b2_pad.at[0, PROJ_OFF:PROJ_OFF + FEAT_DIM].set(p["p2_b"])

    feat_mask = jnp.zeros((1, LANE), jnp.float32)
    feat_mask = feat_mask.at[0, FEAT_OFF:FEAT_OFF + FEAT_DIM].set(inv_hw)

    conv_b4 = jnp.tile(p["conv_b"], GROUPS).reshape(1, LANE)     # [1, 128]

    return dict(conv_w=p["conv_w"], conv_b4=conv_b4,
                w1_fused=w1_fused, b1_fused=b1_fused,
                w2_pad=w2_pad, b2_pad=b2_pad, feat_mask=feat_mask)


# ---------------------------- pure-JAX reference ------------------------------
def reference_forward(x, p):
    xh = jnp.transpose(x, (0, 2, 3, 1))
    y = jax.lax.conv_general_dilated(
        xh, p["conv_w"], window_strides=(1, 1), padding="SAME",
        dimension_numbers=("NHWC", "HWIO", "NHWC"))
    y = jnp.maximum(y + p["conv_b"], 0.0)
    feat = jnp.mean(y, axis=(1, 2))
    out = feat @ p["fc_w"] + p["fc_b"]
    h = jnp.maximum(feat @ p["p1_w"] + p["p1_b"], 0.0)
    proj = h @ p["p2_w"] + p["p2_b"]
    return out, proj, feat


# ------------------------------------ main -------------------------------------
if __name__ == "__main__":
    key = jax.random.PRNGKey(0)
    k_x, k_p = jax.random.split(key)

    x = jax.random.normal(k_x, (2, IN_CH, H, W), dtype=jnp.float32)  # NCHW
    raw_params = init_params(k_p)
    packed = pack_params(raw_params)

    fwd = jax.jit(wrapper_forward,
                  static_argnames=("bb_grad", "act_dtype", "tile_b"))

    # f32 path (exact forward semantics of the PyTorch module).
    out, proj, feat = fwd(x, packed, bb_grad=True)
    jax.block_until_ready((out, proj, feat))

    assert out.shape == (2, NUM_CLASSES)
    assert proj.shape == (2, FEAT_DIM)
    assert feat.shape == (2, FEAT_DIM)

    r_out, r_proj, r_feat = reference_forward(x, raw_params)
    assert jnp.allclose(feat, r_feat, rtol=1e-4, atol=1e-4)
    assert jnp.allclose(out, r_out, rtol=1e-4, atol=1e-4)
    assert jnp.allclose(proj, r_proj, rtol=1e-4, atol=1e-4)

    # bf16-activation path (halves the act HBM traffic); looser tolerance.
    out_b, proj_b, feat_b = fwd(x, packed, bb_grad=True,
                                act_dtype=jnp.bfloat16)
    jax.block_until_ready((out_b, proj_b, feat_b))
    assert jnp.allclose(out_b, r_out, rtol=5e-2, atol=5e-2)
    assert jnp.allclose(proj_b, r_proj, rtol=5e-2, atol=5e-2)
    assert jnp.allclose(feat_b, r_feat, rtol=5e-2, atol=5e-2)

    print("KERNEL_OK")
</pallas_src>

<mosaic_0001>
module attributes {stable_mosaic.version = 11 : i64} {
  func.func @fused_wrapper_kernel(%arg0: i32, %arg1: memref<8x64x128xf32, #tpu.memory_space<vmem>>, %arg2: memref<1x128xf32, #tpu.memory_space<vmem>>, %arg3: memref<128x128xf32, #tpu.memory_space<vmem>>, %arg4: memref<1x128xf32, #tpu.memory_space<vmem>>, %arg5: memref<128x128xf32, #tpu.memory_space<vmem>>, %arg6: memref<1x128xf32, #tpu.memory_space<vmem>>, %arg7: memref<1x128xf32, #tpu.memory_space<vmem>>, %arg8: memref<8x128xf32, #tpu.memory_space<vmem>>) attributes {dimension_semantics = [#tpu.dimension_semantics<parallel>], iteration_bounds = array<i64: 1>, scalar_prefetch = 0 : i64, scratch_operands = 0 : i64, tpu.core_type = #tpu.core_type<tc>, window_params = [{transform_indices = @transform_0, window_bounds = array<i64: 8, 64, 128>}, {pipeline_mode = #tpu.pipeline_mode<synchronous>, transform_indices = @transform_1, window_bounds = array<i64: 1, 128>}, {pipeline_mode = #tpu.pipeline_mode<synchronous>, transform_indices = @transform_2, window_bounds = array<i64: 128, 128>}, {pipeline_mode = #tpu.pipeline_mode<synchronous>, transform_indices = @transform_3, window_bounds = array<i64: 1, 128>}, {pipeline_mode = #tpu.pipeline_mode<synchronous>, transform_indices = @transform_4, window_bounds = array<i64: 128, 128>}, {pipeline_mode = #tpu.pipeline_mode<synchronous>, transform_indices = @transform_5, window_bounds = array<i64: 1, 128>}, {pipeline_mode = #tpu.pipeline_mode<synchronous>, transform_indices = @transform_6, window_bounds = array<i64: 1, 128>}, {transform_indices = @transform_7, window_bounds = array<i64: 8, 128>}]} {
    %c0 = arith.constant 0 : index
    %c0_0 = arith.constant 0 : index
    %c0_1 = arith.constant 0 : index
    %0 = vector.load %arg1[%c0, %c0_0, %c0_1] : memref<8x64x128xf32, #tpu.memory_space<vmem>>, vector<8x64x128xf32>
    %c0_2 = arith.constant 0 : index
    %c0_3 = arith.constant 0 : index
    %1 = vector.load %arg2[%c0_2, %c0_3] : memref<1x128xf32, #tpu.memory_space<vmem>>, vector<1x128xf32>
    %2 = vector.shape_cast %1 : vector<1x128xf32> to vector<1x1x128xf32>
    %3 = vector.broadcast %2 : vector<1x1x128xf32> to vector<8x64x128xf32>
    %4 = arith.addf %0, %3 : vector<8x64x128xf32>
    %cst = arith.constant 0.000000e+00 : f32
    %5 = vector.broadcast %cst : f32 to vector<8x64x128xf32>
    %6 = arith.maximumf %4, %5 : vector<8x64x128xf32>
    %cst_4 = arith.constant dense<0.000000e+00> : vector<8x128xf32>
    %7 = vector.multi_reduction <add>, %6, %cst_4 [1] : vector<8x64x128xf32> to vector<8x128xf32>
    %c64_i32 = arith.constant 64 : i32
    %8 = tpu.dynamic_rotate %7 by %c64_i32 dim 1 : vector<8x128xf32>, i32 -> vector<8x128xf32>
    %9 = arith.addf %7, %8 : vector<8x128xf32>
    %c32_i32 = arith.constant 32 : i32
    %10 = tpu.dynamic_rotate %9 by %c32_i32 dim 1 : vector<8x128xf32>, i32 -> vector<8x128xf32>
    %11 = arith.addf %9, %10 : vector<8x128xf32>
    %c0_5 = arith.constant 0 : index
    %c0_6 = arith.constant 0 : index
    %12 = vector.load %arg3[%c0_5, %c0_6] : memref<128x128xf32, #tpu.memory_space<vmem>>, vector<128x128xf32>
    %cst_7 = arith.constant dense<0.000000e+00> : vector<8x128xf32>
    %13 = tpu.matmul %7, %12, %cst_7 {dimension_numbers = #tpu.dot_dimension_numbers<[1], [0], [0], [1], [0, 0, 1, 1], [], []>} : vector<8x128xf32>, vector<128x128xf32>, vector<8x128xf32> -> vector<8x128xf32>
    %c0_8 = arith.constant 0 : index
    %c0_9 = arith.constant 0 : index
    %14 = vector.load %arg4[%c0_8, %c0_9] : memref<1x128xf32, #tpu.memory_space<vmem>>, vector<1x128xf32>
    %15 = vector.broadcast %14 : vector<1x128xf32> to vector<8x128xf32>
    %16 = arith.addf %13, %15 : vector<8x128xf32>
    %cst_10 = arith.constant 0.000000e+00 : f32
    %17 = vector.broadcast %cst_10 : f32 to vector<8x128xf32>
    %18 = arith.maximumf %16, %17 : vector<8x128xf32>
    %c0_11 = arith.constant 0 : index
    %c0_12 = arith.constant 0 : index
    %19 = vector.load %arg5[%c0_11, %c0_12] : memref<128x128xf32, #tpu.memory_space<vmem>>, vector<128x128xf32>
    %cst_13 = arith.constant dense<0.000000e+00> : vector<8x128xf32>
    %20 = tpu.matmul %18, %19, %cst_13 {dimension_numbers = #tpu.dot_dimension_numbers<[1], [0], [0], [1], [0, 0, 1, 1], [], []>} : vector<8x128xf32>, vector<128x128xf32>, vector<8x128xf32> -> vector<8x128xf32>
    %c0_14 = arith.constant 0 : index
    %c0_15 = arith.constant 0 : index
    %21 = vector.load %arg6[%c0_14, %c0_15] : memref<1x128xf32, #tpu.memory_space<vmem>>, vector<1x128xf32>
    %22 = vector.broadcast %21 : vector<1x128xf32> to vector<8x128xf32>
    %23 = arith.addf %20, %22 : vector<8x128xf32>
    %c0_16 = arith.constant 0 : index
    %c0_17 = arith.constant 0 : index
    %24 = vector.load %arg7[%c0_16, %c0_17] : memref<1x128xf32, #tpu.memory_space<vmem>>, vector<1x128xf32>
    %25 = vector.broadcast %24 : vector<1x128xf32> to vector<8x128xf32>
    %26 = arith.mulf %11, %25 : vector<8x128xf32>
    %27 = arith.addf %16, %26 : vector<8x128xf32>
    %28 = arith.addf %27, %23 : vector<8x128xf32>
    %c0_18 = arith.constant 0 : index
    %c0_19 = arith.constant 0 : index
    %29 = vector.load %arg8[%c0_18, %c0_19] : memref<8x128xf32, #tpu.memory_space<vmem>>, vector<8x128xf32>
    tpu.vector_store %arg8[%c0_18, %c0_19], %28 {strides = array<i32>} : memref<8x128xf32, #tpu.memory_space<vmem>>, vector<8x128xf32>,
    return
  }
  func.func @transform_0(%arg0: i32) -> (i32, i32, i32) {
    %c0_i32 = arith.constant 0 : i32
    %c0_i32_0 = arith.constant 0 : i32
    %c0_i32_1 = arith.constant 0 : i32
    return %arg0, %c0_i32, %c0_i32_0 : i32, i32, i32
  }
  func.func @transform_1(%arg0: i32) -> (i32, i32) {
    %c0_i32 = arith.constant 0 : i32
    %c0_i32_0 = arith.constant 0 : i32
    %c0_i32_1 = arith.constant 0 : i32
    return %c0_i32, %c0_i32_0 : i32, i32
  }
  func.func @transform_2(%arg0: i32) -> (i32, i32) {
    %c0_i32 = arith.constant 0 : i32
    %c0_i32_0 = arith.constant 0 : i32
    %c0_i32_1 = arith.constant 0 : i32
    return %c0_i32, %c0_i32_0 : i32, i32
  }
  func.func @transform_3(%arg0: i32) -> (i32, i32) {
    %c0_i32 = arith.constant 0 : i32
    %c0_i32_0 = arith.constant 0 : i32
    %c0_i32_1 = arith.constant 0 : i32
    return %c0_i32, %c0_i32_0 : i32, i32
  }
  func.func @transform_4(%arg0: i32) -> (i32, i32) {
    %c0_i32 = arith.constant 0 : i32
    %c0_i32_0 = arith.constant 0 : i32
    %c0_i32_1 = arith.constant 0 : i32
    return %c0_i32, %c0_i32_0 : i32, i32
  }
  func.func @transform_5(%arg0: i32) -> (i32, i32) {
    %c0_i32 = arith.constant 0 : i32
    %c0_i32_0 = arith.constant 0 : i32
    %c0_i32_1 = arith.constant 0 : i32
    return %c0_i32, %c0_i32_0 : i32, i32
  }
  func.func @transform_6(%arg0: i32) -> (i32, i32) {
    %c0_i32 = arith.constant 0 : i32
    %c0_i32_0 = arith.constant 0 : i32
    %c0_i32_1 = arith.constant 0 : i32
    return %c0_i32, %c0_i32_0 : i32, i32
  }
  func.func @transform_7(%arg0: i32) -> (i32, i32) {
    %c0_i32 = arith.constant 0 : i32
    %c0_i32_0 = arith.constant 0 : i32
    return %arg0, %c0_i32 : i32, i32
  }
}

</mosaic_0001>

<bundles_post_ra>
// kernel: wrapper_forward.1
= control target key start
LH: loop header
LB: loop body
LE: loop exit
PB: predicated region body
PF: predicated region fallthrough
CT: control target
= control target key end

     0   :  { %v1561_v0 = vmov 0.0|0.0   ;;  %vm821_vm0 = vmmov 0   ;;  %v822_v4 = vmov 0.0   ;;  %vm337_vm1 = vcmask 1041409   ;;  %s1553_s2 = inlined_call_operand.vmem [shape: f32[128,128], index: 2, kind: input, shape index: {}]   ;;  %s1554_s0 = inlined_call_operand.vmem [shape: f32[8,64,128], index: 0, kind: input, shape index: {}]   ;;  %s1555_s1 = inlined_call_operand.vmem [shape: f32[1,128], index: 1, kind: input, shape index: {}]   ;;  %s1556_s4 = inlined_call_operand.vmem [shape: f32[128,128], index: 4, kind: input, shape index: {}]   ;;  %s1557_s3 = inlined_call_operand.vmem [shape: f32[1,128], index: 3, kind: input, shape index: {}]   ;;  %s1558_s6 = inlined_call_operand.vmem [shape: f32[1,128], index: 6, kind: input, shape index: {}]   ;;  %s1559_s5 = inlined_call_operand.vmem [shape: f32[1,128], index: 5, kind: input, shape index: {}]   ;;  %s1560_s7 = inlined_call_operand.vmem [shape: f32[8,128], index: 7, kind: output, shape index: {}]  }
   0x1   :  { %767 = vmatprep.subr.bf16.mxu0 %v1561_v0  ;;  %v427_v1 = vld [vmem:[%s1553_s2] sm:$0xff]  ;;  %v428_v2 = vld [vmem:[%s1553_s2 + $0x8] sm:$0xff]  ;;  %v429_v3 = vld [vmem:[%s1553_s2 + $0x10] sm:$0xff]  ;;  %729 = vmatprep.mubr.msk.f32.mxu0 %vm821_vm0, %v822_v4  ;;  %vm339_vm2 = vcmask 1042434   ;;  %vm341_vm3 = vcmask 1043459   ;;  %vm343_vm4 = vcmask 1044484  }
   0x2   :  { %v768_v5 = vpack.c.bf16 %v428_v2, %v427_v1  ;;  %v430_v6 = vld [vmem:[%s1553_s2 + $0x18] sm:$0xff]  ;;  %791 = vmatprep.subr.bf16.mxu1 %v1561_v0  ;;  %764 = vmatprep.mubr.msk.f32.mxu1 %vm821_vm0, %v822_v4  ;;  %v431_v8 = vld [vmem:[%s1553_s2 + $0x20] sm:$0xff]  ;;  %v432_v9 = vld [vmem:[%s1553_s2 + $0x28] sm:$0xff]  ;;  %vm345_vm5 = vcmask 1045509   ;;  %vm347_vm6 = vcmask 1046534   ;;  %vm349_vm7 = vcmask 1047559  }
   0x3   :  { %v771_v7 = vpack.c.bf16 %v430_v6, %v429_v3  ;;  %v774_v10 = vpack.c.bf16 %v432_v9, %v431_v8  ;;  %v433_v11 = vld [vmem:[%s1553_s2 + $0x30] sm:$0xff]  ;;  %v434_v12 = vld [vmem:[%s1553_s2 + $0x38] sm:$0xff]  ;;  %v435_v14 = vld [vmem:[%s1553_s2 + $0x40] sm:$0xff] }
   0x4   :  { %769 = vmatpush3.bf16.msra.mxu0 %v768_v5  ;;  %v777_v13 = vpack.c.bf16 %v434_v12, %v433_v11  ;;  %v436_v15 = vld [vmem:[%s1553_s2 + $0x48] sm:$0xff]  ;;  %v437_v17 = vld [vmem:[%s1553_s2 + $0x50] sm:$0xff]  ;;  %v438_v18 = vld [vmem:[%s1553_s2 + $0x58] sm:$0xff] }
   0x5   :  { %770 = vmatprep.subr.bf16.mxu0 %v1561_v0  ;;  %v780_v16 = vpack.c.bf16 %v436_v15, %v435_v14  ;;  %v783_v19 = vpack.c.bf16 %v438_v18, %v437_v17  ;;  %v439_v20 = vld [vmem:[%s1553_s2 + $0x60] sm:$0xff]  ;;  %v440_v21 = vld [vmem:[%s1553_s2 + $0x68] sm:$0xff]  ;;  %v441_v22 = vld [vmem:[%s1553_s2 + $0x70] sm:$0xff] }
   0x6   :  { %v442_v23 = vld [vmem:[%s1553_s2 + $0x78] sm:$0xff]  ;;  %v26_v24 = vld [vmem:[%s1554_s0] sm:$0xff]  ;;  %v27_v25 = vld [vmem:[%s1554_s0 + $0x8] sm:$0xff]  ;;  %v786_v28 = vpack.c.bf16 %v440_v21, %v439_v20 }
   0x7   :  { %v28_v26 = vld [vmem:[%s1554_s0 + $0x10] sm:$0xff]  ;;  %v29_v27 = vld [vmem:[%s1554_s0 + $0x18] sm:$0xff]  ;;  %v30_v29 = vld [vmem:[%s1554_s0 + $0x20] sm:$0xff]  ;;  %v789_v41 = vpack.c.bf16 %v442_v23, %v441_v22 }
   0x8   :  { %772 = vmatpush3.bf16.msra.mxu0 %v771_v7  ;;  %v31_v30 = vld [vmem:[%s1554_s0 + $0x28] sm:$0xff]  ;;  %v32_v31 = vld [vmem:[%s1554_s0 + $0x30] sm:$0xff]  ;;  %v33_v32 = vld [vmem:[%s1554_s0 + $0x38] sm:$0xff] }
   0x9   :  { %773 = vmatprep.subr.bf16.mxu0 %v1561_v0  ;;  %v34_v33 = vld [vmem:[%s1554_s0 + $0x40] sm:$0xff]  ;;  %v35_v34 = vld [vmem:[%s1554_s0 + $0x48] sm:$0xff]  ;;  %v36_v35 = vld [vmem:[%s1554_s0 + $0x50] sm:$0xff] }
   0xa   :  { %v37_v36 = vld [vmem:[%s1554_s0 + $0x58] sm:$0xff]  ;;  %v38_v37 = vld [vmem:[%s1554_s0 + $0x60] sm:$0xff]  ;;  %v39_v38 = vld [vmem:[%s1554_s0 + $0x68] sm:$0xff] }
   0xb   :  { %v40_v39 = vld [vmem:[%s1554_s0 + $0x70] sm:$0xff]  ;;  %v41_v40 = vld [vmem:[%s1554_s0 + $0x78] sm:$0xff]  ;;  %v42_v42 = vld [vmem:[%s1554_s0 + $0x80] sm:$0xff] }
   0xc   :  { %775 = vmatpush3.bf16.msra.mxu0 %v774_v10  ;;  %v43_v43 = vld [vmem:[%s1554_s0 + $0x88] sm:$0xff]  ;;  %v44_v44 = vld [vmem:[%s1554_s0 + $0x90] sm:$0xff]  ;;  %v45_v45 = vld [vmem:[%s1554_s0 + $0x98] sm:$0xff] }
   0xd   :  { %776 = vmatprep.subr.bf16.mxu0 %v1561_v0  ;;  %v984_v46 = vld [vmem:[%s1555_s1] ss:$0 sm:$0xff]  ;;  %v47_v48 = vld [vmem:[%s1554_s0 + $0xa8] sm:$0xff]  ;;  %v48_v49 = vld [vmem:[%s1554_s0 + $0xb0] sm:$0xff] }
   0xe   :  { %v46_v47 = vld [vmem:[%s1554_s0 + $0xa0] sm:$0xff]  ;;  %v49_v50 = vld [vmem:[%s1554_s0 + $0xb8] sm:$0xff]  ;;  %v999_v51 = vadd.f32 %v984_v46, %v26_v24  ;;  %v1002_v52 = vadd.f32 %v984_v46, %v27_v25  ;;  %v1005_v53 = vadd.f32 %v984_v46, %v28_v26  ;;  %v1008_v54 = vadd.f32 %v984_v46, %v29_v27  ;;  %v51_v56 = vld [vmem:[%s1554_s0 + $0xc8] sm:$0xff] }
   0xf   :  { %v50_v55 = vld [vmem:[%s1554_s0 + $0xc0] sm:$0xff]  ;;  %v52_v57 = vld [vmem:[%s1554_s0 + $0xd0] sm:$0xff]  ;;  %v53_v58 = vld [vmem:[%s1554_s0 + $0xd8] sm:$0xff]  ;;  %v1024_v59 = vadd.f32 %v984_v46, %v30_v29  ;;  %v1027_v60 = vadd.f32 %v984_v46, %v31_v30  ;;  %v1030_v61 = vadd.f32 %v984_v46, %v32_v31  ;;  %v1033_v62 = vadd.f32 %v984_v46, %v33_v32 }
  0x10   :  { %778 = vmatpush3.bf16.msra.mxu0 %v777_v13  ;;  %v54_v63 = vld [vmem:[%s1554_s0 + $0xe0] sm:$0xff]  ;;  %v55_v1 = vld [vmem:[%s1554_s0 + $0xe8] sm:$0xff]  ;;  %v56_v2 = vld [vmem:[%s1554_s0 + $0xf0] sm:$0xff]  ;;  %v1048_v4 = vadd.f32 %v984_v46, %v34_v33  ;;  %v1051_v5 = vadd.f32 %v984_v46, %v35_v34  ;;  %v1054_v6 = vadd.f32 %v984_v46, %v36_v35  ;;  %v1057_v7 = vadd.f32 %v984_v46, %v37_v36 }
  0x11   :  { %779 = vmatprep.subr.bf16.mxu0 %v1561_v0  ;;  %1581 = vst [vmem:[#allocation2_spill] sm:$0xff] %v1027_v60  ;;  %1582 = vst [vmem:[#allocation3_spill] sm:$0xff] %v1030_v61  ;;  %v57_v3 = vld [vmem:[%s1554_s0 + $0xf8] sm:$0xff]  ;;  %v58_v8 = vld [vmem:[%s1554_s0 + $0x100] sm:$0xff]  ;;  %v1072_v12 = vadd.f32 %v984_v46, %v38_v37  ;;  %v1075_v13 = vadd.f32 %v984_v46, %v39_v38  ;;  %v1078_v14 = vadd.f32 %v984_v46, %v40_v39 }
  0x12   :  { %1583 = vst [vmem:[#allocation4_spill] sm:$0xff] %v1033_v62  ;;  %v59_v9 = vld [vmem:[%s1554_s0 + $0x108] sm:$0xff]  ;;  %v60_v10 = vld [vmem:[%s1554_s0 + $0x110] sm:$0xff]  ;;  %v61_v11 = vld [vmem:[%s1554_s0 + $0x118] sm:$0xff]  ;;  %v1081_v15 = vadd.f32 %v984_v46, %v41_v40  ;;  %v1096_v20 = vadd.f32 %v984_v46, %v42_v42  ;;  %v1099_v21 = vadd.f32 %v984_v46, %v43_v43  ;;  %v1102_v22 = vadd.f32 %v984_v46, %v44_v44 }
  0x13   :  { %1584 = vst [vmem:[#allocation5_spill] sm:$0xff] %v1075_v13  ;;  %1585 = vst [vmem:[#allocation6_spill] sm:$0xff] %v1078_v14  ;;  %v63_v17 = vld [vmem:[%s1554_s0 + $0x128] sm:$0xff]  ;;  %v64_v18 = vld [vmem:[%s1554_s0 + $0x130] sm:$0xff]  ;;  %v1105_v23 = vadd.f32 %v984_v46, %v45_v45  ;;  %v1117_v27 = vadd.f32 %v984_v46, %v46_v47  ;;  %v1123_v29 = vadd.f32 %v984_v46, %v48_v49 }
  0x14   :  { %781 = vmatpush3.bf16.msra.mxu0 %v780_v16  ;;  %1586 = vst [vmem:[#allocation7_spill] sm:$0xff] %v1081_v15  ;;  %v62_v16 = vld [vmem:[%s1554_s0 + $0x120] sm:$0xff]  ;;  %v67_v25 = vld [vmem:[%s1554_s0 + $0x148] sm:$0xff]  ;;  %v68_v26 = vld [vmem:[%s1554_s0 + $0x150] sm:$0xff]  ;;  %v1126_v30 = vadd.f32 %v984_v46, %v49_v50  ;;  %v1138_v34 = vadd.f32 %v984_v46, %v50_v55  ;;  %v1141_v35 = vadd.f32 %v984_v46, %v51_v56 }
  0x15   :  { %782 = vmatprep.subr.bf16.mxu0 %v1561_v0  ;;  %v66_v24 = vld [vmem:[%s1554_s0 + $0x140] sm:$0xff]  ;;  %1588 = vst [vmem:[#allocation9_spill] sm:$0xff] %v1123_v29  ;;  %v69_v31 = vld [vmem:[%s1554_s0 + $0x158] sm:$0xff]  ;;  %v71_v33 = vld [vmem:[%s1554_s0 + $0x168] sm:$0xff]  ;;  %v1144_v36 = vadd.f32 %v984_v46, %v52_v57  ;;  %v1147_v37 = vadd.f32 %v984_v46, %v53_v58  ;;  %v1162_v42 = vadd.f32 %v984_v46, %v55_v1 }
  0x16   :  { %1589 = vst [vmem:[#allocation10_spill] sm:$0xff] %v1126_v30  ;;  %v70_v32 = vld [vmem:[%s1554_s0 + $0x160] sm:$0xff]  ;;  %v72_v38 = vld [vmem:[%s1554_s0 + $0x170] sm:$0xff]  ;;  %v73_v39 = vld [vmem:[%s1554_s0 + $0x178] sm:$0xff]  ;;  %v1165_v43 = vadd.f32 %v984_v46, %v56_v2  ;;  %v1168_v44 = vadd.f32 %v984_v46, %v57_v3  ;;  %v1180_v49 = vadd.f32 %v984_v46, %v58_v8  ;;  %v1183_v50 = vadd.f32 %v984_v46, %v59_v9 }
  0x17   :  { %v74_v40 = vld [vmem:[%s1554_s0 + $0x180] sm:$0xff]  ;;  %1590 = vst [vmem:[#allocation11_spill] sm:$0xff] %v1162_v42  ;;  %v75_v45 = vld [vmem:[%s1554_s0 + $0x188] sm:$0xff]  ;;  %v76_v47 = vld [vmem:[%s1554_s0 + $0x190] sm:$0xff]  ;;  %v1186_v55 = vadd.f32 %v984_v46, %v60_v10  ;;  %v1189_v56 = vadd.f32 %v984_v46, %v61_v11  ;;  %v1201_v1 = vadd.f32 %v984_v46, %v62_v16  ;;  %v1204_v2 = vadd.f32 %v984_v46, %v63_v17 }
  0x18   :  { %784 = vmatpush3.bf16.msra.mxu0 %v783_v19  ;;  %v65_v19 = vld [vmem:[%s1554_s0 + $0x138] sm:$0xff]  ;;  %1591 = vst [vmem:[#allocation12_spill] sm:$0xff] %v1165_v43  ;;  %1592 = vst [vmem:[#allocation13_spill] sm:$0xff] %v1168_v44  ;;  %v78_v57 = vld [vmem:[%s1554_s0 + $0x1a0] sm:$0xff]  ;;  %v1207_v3 = vadd.f32 %v984_v46, %v64_v18  ;;  %v1222_v16 = vadd.f32 %v984_v46, %v66_v24  ;;  %v1225_v17 = vadd.f32 %v984_v46, %v67_v25 }
  0x19   :  { %785 = vmatprep.subr.bf16.mxu0 %v1561_v0  ;;  %v79_v58 = vld [vmem:[%s1554_s0 + $0x1a8] sm:$0xff]  ;;  %1593 = vst [vmem:[#allocation14_spill] sm:$0xff] %v1204_v2  ;;  %v1210_v8 = vadd.f32 %v984_v46, %v65_v19  ;;  %v81_v9 = vld [vmem:[%s1554_s0 + $0x1b8] sm:$0xff]  ;;  %v82_v10 = vld [vmem:[%s1554_s0 + $0x1c0] sm:$0xff]  ;;  %v1228_v18 = vadd.f32 %v984_v46, %v68_v26  ;;  %v1231_v19 = vadd.f32 %v984_v46, %v69_v31 }
  0x1a   :  { %1594 = vst [vmem:[#allocation15_spill] sm:$0xff] %v1207_v3  ;;  %v83_v11 = vld [vmem:[%s1554_s0 + $0x1c8] sm:$0xff]  ;;  %1596 = vst [vmem:[#allocation17_spill] sm:$0xff] %v1225_v17  ;;  %v86_v24 = vld [vmem:[%s1554_s0 + $0x1e0] sm:$0xff]  ;;  %v1243_v25 = vadd.f32 %v984_v46, %v70_v32  ;;  %v1246_v26 = vadd.f32 %v984_v46, %v71_v33  ;;  %v1249_v31 = vadd.f32 %v984_v46, %v72_v38 }
  0x1b   :  { %1595 = vst [vmem:[#allocation16_spill] sm:$0xff] %v1210_v8  ;;  %1597 = vst [vmem:[#allocation18_spill] sm:$0xff] %v1228_v18  ;;  %v85_v8 = vld [vmem:[%s1554_s0 + $0x1d8] sm:$0xff]  ;;  %v87_v18 = vld [vmem:[%s1554_s0 + $0x1e8] sm:$0xff]  ;;  %v1264_v33 = vadd.f32 %v984_v46, %v74_v40  ;;  %v1267_v38 = vadd.f32 %v984_v46, %v75_v45  ;;  %v1285_v40 = vadd.f32 %v984_v46, %v81_v9 }
  0x1c   :  { %787 = vmatpush3.bf16.msra.mxu0 %v786_v28  ;;  %v1120_v28 = vadd.f32 %v984_v46, %v47_v48  ;;  %v77_v48 = vld [vmem:[%s1554_s0 + $0x198] sm:$0xff]  ;;  %1598 = vst [vmem:[#allocation19_spill] sm:$0xff] %v1231_v19  ;;  %1599 = vst [vmem:[#allocation20_spill] sm:$0xff] %v1243_v25  ;;  %v1252_v19 = vadd.f32 %v984_v46, %v73_v39  ;;  %v88_v17 = vld [vmem:[%s1554_s0 + $0x1f0] sm:$0xff]  ;;  %v1270_v39 = vadd.f32 %v984_v46, %v76_v47 }
  0x1d   :  { %788 = vmatprep.subr.bf16.mxu0 %v1561_v0  ;;  %v84_v0 = vld [vmem:[%s1554_s0 + $0x1d0] sm:$0xff]  ;;  %1600 = vst [vmem:[#allocation21_spill] sm:$0xff] %v1246_v26  ;;  %1601 = vst [vmem:[#allocation22_spill] sm:$0xff] %v1249_v31  ;;  %v89_v32 = vld [vmem:[%s1554_s0 + $0x1f8] sm:$0xff]  ;;  %v1276_v31 = vadd.f32 %v984_v46, %v78_v57  ;;  %v1279_v26 = vadd.f32 %v984_v46, %v79_v58  ;;  %v1288_v45 = vadd.f32 %v984_v46, %v82_v10 }
  0x1e   :  { %1587 = vst [vmem:[#allocation8_spill] sm:$0xff] %v1120_v28  ;;  %1602 = vst [vmem:[#allocation23_spill] sm:$0xff] %v1252_v19  ;;  %v1273_v19 = vadd.f32 %v984_v46, %v77_v48  ;;  %v1291_v47 = vadd.f32 %v984_v46, %v83_v11  ;;  %v1294_v48 = vadd.f32 %v984_v46, %v84_v0 }
  0x1f   :  { %1603 = vst [vmem:[#allocation24_spill] sm:$0xff] %v1285_v40  ;;  %v1297_v57 = vadd.f32 %v984_v46, %v85_v8  ;;  %v1300_v58 = vadd.f32 %v984_v46, %v86_v24  ;;  %v1306_v9 = vadd.f32 %v984_v46, %v88_v17  ;;  %v1309_v10 = vadd.f32 %v984_v46, %v89_v32 }
  0x20   :  { %790 = vmatpush3.bf16.msra.mxu0 %v789_v41  ;;  %v1159_v41 = vadd.f32 %v984_v46, %v54_v63  ;;  %v80_v63 = vld [vmem:[%s1554_s0 + $0x1b0] sm:$0xff]  ;;  %1604 = vst [vmem:[#allocation25_spill] sm:$0xff] %v1294_v48  ;;  %v178_v17 = vmax.f32 %v1099_v21, 0.0  ;;  %v185_v24 = vmax.f32 %v1138_v34, 0.0  ;;  %v188_v21 = vmax.f32 %v1147_v37, 0.0  ;;  %s823_s0 = smov 64  }
  0x21   :  { %v1282_v25 = vadd.f32 %v984_v46, %v80_v63  ;;  %1605 = vst [vmem:[#allocation26_spill] sm:$0xff] %v1300_v58  ;;  %v1303_v63 = vadd.f32 %v984_v46, %v87_v18  ;;  %1606 = vst [vmem:[#allocation27_spill] sm:$0xff] %v1306_v9  ;;  %v169_v9 = vmax.f32 %v1048_v4, 0.0  ;;  %v170_v46 = vmax.f32 %v1051_v5, 0.0  ;;  %v1608_v30 = vld [vmem:[#allocation17_spill] sm:$0xff] }
  0x22   :  { %v177_v18 = vmax.f32 %v1096_v20, 0.0  ;;  %v179_v4 = vmax.f32 %v1102_v22, 0.0  ;;  %v186_v58 = vmax.f32 %v1141_v35, 0.0  ;;  %v187_v20 = vmax.f32 %v1144_v36, 0.0  ;;  %v1609_v44 = vld [vmem:[#allocation18_spill] sm:$0xff] }
  0x23   :  { %v193_v48 = vmax.f32 %v1180_v49, 0.0  ;;  %v194_v8 = vmax.f32 %v1183_v50, 0.0  ;;  %v195_v34 = vmax.f32 %v1186_v55, 0.0  ;;  %v196_v35 = vmax.f32 %v1189_v56, 0.0  ;;  %v1610_v15 = vld [vmem:[#allocation19_spill] sm:$0xff]  ;;  %v1611_v62 = vld [vmem:[#allocation20_spill] sm:$0xff] }
  0x24   :  { %v197_v36 = vmax.f32 %v1201_v1, 0.0  ;;  %v201_v32 = vmax.f32 %v1222_v16, 0.0  ;;  %v202_v0 = vmax.f32 %v1608_v30, 0.0  ;;  %v203_v49 = vmax.f32 %v1609_v44, 0.0  ;;  %v1612_v43 = vld [vmem:[#allocation21_spill] sm:$0xff] }
  0x25   :  { %v204_v50 = vmax.f32 %v1610_v15, 0.0  ;;  %v205_v55 = vmax.f32 %v1611_v62, 0.0  ;;  %v206_v56 = vmax.f32 %v1612_v43, 0.0  ;;  %v209_v22 = vmax.f32 %v1264_v33, 0.0 }
  0x26   :  { %v210_v5 = vmax.f32 %v1267_v38, 0.0  ;;  %v211_v16 = vmax.f32 %v1270_v39, 0.0  ;;  %v212_v30 = vmax.f32 %v1273_v19, 0.0  ;;  %v213_v44 = vmax.f32 %v1276_v31, 0.0 }
  0x27   :  { %v214_v15 = vmax.f32 %v1279_v26, 0.0  ;;  %v215_v62 = vmax.f32 %v1282_v25, 0.0  ;;  %v217_v1 = vmax.f32 %v1288_v45, 0.0  ;;  %v218_v37 = vmax.f32 %v1291_v47, 0.0  ;;  %v1615_v14 = vld [vmem:[#allocation25_spill] sm:$0xff] }
  0x28   :  { %v219_v33 = vmax.f32 %v1615_v14, 0.0  ;;  %v220_v38 = vmax.f32 %v1297_v57, 0.0  ;;  %v1616_v11 = vld [vmem:[#allocation26_spill] sm:$0xff]  ;;  %v222_v19 = vmax.f32 %v1303_v63, 0.0  ;;  %v1617_v29 = vld [vmem:[#allocation27_spill] sm:$0xff]  ;;  %v224_v26 = vmax.f32 %v1309_v10, 0.0 }
  0x29   :  { %v221_v39 = vmax.f32 %v1616_v11, 0.0  ;;  %v223_v31 = vmax.f32 %v1617_v29, 0.0  ;;  %v1618_v25 = vmax.f32 %v999_v51, 0.0  ;;  %v1619_v43 = vmax.f32 %v1002_v52, 0.0 }
  0x2a   :  { %v238_v45 = vadd.f32 %v170_v46, %v169_v9  ;;  %v251_v3 = vadd.f32 %v178_v17, %v177_v18  ;;  %v264_v47 = vadd.f32 %v186_v58, %v185_v24  ;;  %v277_v61 = vadd.f32 %v194_v8, %v193_v48 }
  0x2b   :  { %v225_v40 = vadd.f32 %v1619_v43, %v1618_v25  ;;  %v290_v14 = vadd.f32 %v202_v0, %v201_v32  ;;  %v303_v2 = vadd.f32 %v210_v5, %v209_v22  ;;  %v316_v57 = vadd.f32 %v218_v37, %v217_v1  ;;  %v1635_v37 = vld [vmem:[#allocation11_spill] sm:$0xff]  ;;  %v1643_v25 = vld [vmem:[#allocation9_spill] sm:$0xff] }
  0x2c   :  { %v1620_v11 = vmax.f32 %v1005_v53, 0.0  ;;  %v1621_v63 = vmax.f32 %v1054_v6, 0.0  ;;  %v252_v28 = vadd.f32 %v251_v3, %v179_v4  ;;  %v265_v10 = vadd.f32 %v264_v47, %v187_v20 }
  0x2d   :  { %v278_v13 = vadd.f32 %v277_v61, %v195_v34  ;;  %v291_v51 = vadd.f32 %v290_v14, %v203_v49  ;;  %v304_v60 = vadd.f32 %v303_v2, %v211_v16  ;;  %v317_v52 = vadd.f32 %v316_v57, %v219_v33  ;;  %v1633_v34 = vld [vmem:[#allocation8_spill] sm:$0xff]  ;;  %v1641_v33 = vld [vmem:[#allocation6_spill] sm:$0xff] }
  0x2e   :  { %v226_v42 = vadd.f32 %v225_v40, %v1620_v11  ;;  %v239_v29 = vadd.f32 %v238_v45, %v1621_v63  ;;  %v1622_v9 = vmax.f32 %v1008_v54, 0.0  ;;  %v1623_v48 = vmax.f32 %v1057_v7, 0.0  ;;  %v1645_v14 = vld [vmem:[#allocation12_spill] sm:$0xff]  ;;  %v1647_v63 = vld [vmem:[#allocation15_spill] sm:$0xff] }
  0x2f   :  { %v1624_v0 = vmax.f32 %v1105_v23, 0.0  ;;  %v266_v53 = vadd.f32 %v265_v10, %v188_v21  ;;  %v279_v40 = vadd.f32 %v278_v13, %v196_v35  ;;  %v292_v24 = vadd.f32 %v291_v51, %v204_v50  ;;  %v1629_v13 = vld [vmem:[#allocation2_spill] sm:$0xff]  ;;  %v1631_v21 = vld [vmem:[#allocation5_spill] sm:$0xff] }
  0x30   :  { %v227_v18 = vadd.f32 %v226_v42, %v1622_v9  ;;  %v240_v58 = vadd.f32 %v239_v29, %v1623_v48  ;;  %v305_v6 = vadd.f32 %v304_v60, %v212_v30  ;;  %v318_v17 = vadd.f32 %v317_v52, %v220_v38  ;;  %v1637_v50 = vld [vmem:[#allocation14_spill] sm:$0xff]  ;;  %v1639_v30 = vld [vmem:[#allocation3_spill] sm:$0xff]  ;;  %v1651_v9 = vld [vmem:[#allocation4_spill] sm:$0xff] }
  0x31   :  { %v253_v8 = vadd.f32 %v252_v28, %v1624_v0  ;;  %v1625_v3 = vmax.f32 %v1024_v59, 0.0  ;;  %v1626_v2 = vmax.f32 %v1072_v12, 0.0  ;;  %v1627_v54 = vmax.f32 %v1117_v27, 0.0  ;;  %v1649_v51 = vld [vmem:[#allocation22_spill] sm:$0xff] }
  0x32   :  { %v1628_v7 = vmax.f32 %v1159_v41, 0.0  ;;  %v280_v4 = vadd.f32 %v279_v40, %v197_v36  ;;  %v293_v23 = vadd.f32 %v292_v24, %v205_v55  ;;  %v306_v28 = vadd.f32 %v305_v6, %v213_v44  ;;  %v1657_v6 = vld [vmem:[#allocation13_spill] sm:$0xff] }
  0x33   :  { %v228_v61 = vadd.f32 %v227_v18, %v1625_v3  ;;  %v241_v46 = vadd.f32 %v240_v58, %v1626_v2  ;;  %v254_v42 = vadd.f32 %v253_v8, %v1627_v54  ;;  %v319_v5 = vadd.f32 %v318_v17, %v221_v39  ;;  %v1653_v58 = vld [vmem:[#allocation7_spill] sm:$0xff] }
  0x34   :  { %v267_v32 = vadd.f32 %v266_v53, %v1628_v7  ;;  %v1630_v20 = vmax.f32 %v1629_v13, 0.0  ;;  %v1632_v22 = vmax.f32 %v1631_v21, 0.0  ;;  %v1634_v35 = vmax.f32 %v1633_v34, 0.0  ;;  %v1655_v53 = vld [vmem:[#allocation10_spill] sm:$0xff]  ;;  %v1661_v54 = vld [vmem:[#allocation23_spill] sm:$0xff] }
  0x35   :  { %v1636_v49 = vmax.f32 %v1635_v37, 0.0  ;;  %v1638_v1 = vmax.f32 %v1637_v50, 0.0  ;;  %v294_v16 = vadd.f32 %v293_v23, %v206_v56  ;;  %v307_v36 = vadd.f32 %v306_v28, %v214_v15 }
  0x36   :  { %v229_v60 = vadd.f32 %v228_v61, %v1630_v20  ;;  %v242_v59 = vadd.f32 %v241_v46, %v1632_v22  ;;  %v255_v12 = vadd.f32 %v254_v42, %v1634_v35  ;;  %v320_v55 = vadd.f32 %v319_v5, %v222_v19  ;;  %v1659_v61 = vld [vmem:[#allocation16_spill] sm:$0xff] }
  0x37   :  { %v268_v27 = vadd.f32 %v267_v32, %v1636_v49  ;;  %v281_v41 = vadd.f32 %v280_v4, %v1638_v1  ;;  %v1640_v44 = vmax.f32 %v1639_v30, 0.0  ;;  %v1642_v38 = vmax.f32 %v1641_v33, 0.0 }
  0x38   :  { %v1644_v45 = vmax.f32 %v1643_v25, 0.0  ;;  %v1646_v57 = vmax.f32 %v1645_v14, 0.0  ;;  %v1648_v29 = vmax.f32 %v1647_v63, 0.0  ;;  %v1650_v52 = vmax.f32 %v1649_v51, 0.0 }
  0x39   :  { %v230_v43 = vadd.f32 %v229_v60, %v1640_v44  ;;  %v243_v39 = vadd.f32 %v242_v59, %v1642_v38  ;;  %v308_v15 = vadd.f32 %v307_v36, %v215_v62  ;;  %v321_v19 = vadd.f32 %v320_v55, %v223_v31  ;;  %v1663_v62 = vld [vmem:[#allocation24_spill] sm:$0xff] }
  0x3a   :  { %v256_v47 = vadd.f32 %v255_v12, %v1644_v45  ;;  %v269_v11 = vadd.f32 %v268_v27, %v1646_v57  ;;  %v282_v10 = vadd.f32 %v281_v41, %v1648_v29  ;;  %v295_v56 = vadd.f32 %v294_v16, %v1650_v52 }
  0x3b   :  { %v1652_v18 = vmax.f32 %v1651_v9, 0.0  ;;  %v1654_v0 = vmax.f32 %v1653_v58, 0.0  ;;  %v1656_v40 = vmax.f32 %v1655_v53, 0.0  ;;  %v1658_v17 = vmax.f32 %v1657_v6, 0.0 }
  0x3c   :  { %v1660_v2 = vmax.f32 %v1659_v61, 0.0  ;;  %v1662_v42 = vmax.f32 %v1661_v54, 0.0  ;;  %v1664_v31 = vmax.f32 %v1663_v62, 0.0  ;;  %v322_v4 = vadd.f32 %v321_v19, %v224_v26  ;;  %v523_v54 = vld [vmem:[%s1556_s4 + $0x10] sm:$0xff] }
  0x3d   :  { %v231_v48 = vadd.f32 %v230_v43, %v1652_v18  ;;  %v244_v8 = vadd.f32 %v243_v39, %v1654_v0  ;;  %v257_v24 = vadd.f32 %v256_v47, %v1656_v40  ;;  %v270_v3 = vadd.f32 %v269_v11, %v1658_v17 }
  0x3e   :  { %v283_v46 = vadd.f32 %v282_v10, %v1660_v2  ;;  %v296_v7 = vadd.f32 %v295_v56, %v1662_v42  ;;  %v309_v32 = vadd.f32 %v308_v15, %v1664_v31  ;;  %v323_v22 = vrot.slane %v322_v4, 4  ;;  %v521_v2 = vld [vmem:[%s1556_s4] sm:$0xff] }
  0x3f   :  { %v232_v23 = vrot.slane %v231_v48, 4  ;;  %v245_v28 = vrot.slane %v244_v8, 4  ;;  %v258_v5 = vrot.slane %v257_v24, 4  ;;  %v271_v13 = vrot.slane %v270_v3, 4 }
  0x40   :  { %v284_v20 = vrot.slane %v283_v46, 4  ;;  %v297_v60 = vrot.slane %v296_v7, 4  ;;  %v310_v21 = vrot.slane %v309_v32, 4  ;;  %v324_v50 = vadd.f32 %v323_v22, %v322_v4  ;;  %v526_v4 = vld [vmem:[%s1556_s4 + $0x28] sm:$0xff]  ;;  %v531_v22 = vld [vmem:[%s1556_s4 + $0x50] sm:$0xff] }
  0x41   :  { %v233_v59 = vadd.f32 %v232_v23, %v231_v48  ;;  %v246_v34 = vadd.f32 %v245_v28, %v244_v8  ;;  %v259_v35 = vadd.f32 %v258_v5, %v257_v24  ;;  %v272_v12 = vadd.f32 %v271_v13, %v270_v3  ;;  %v527_v28 = vld [vmem:[%s1556_s4 + $0x30] sm:$0xff]  ;;  %v528_v5 = vld [vmem:[%s1556_s4 + $0x38] sm:$0xff] }
  0x42   :  { %v285_v37 = vadd.f32 %v284_v20, %v283_v46  ;;  %v298_v49 = vadd.f32 %v297_v60, %v296_v7  ;;  %v311_v27 = vadd.f32 %v310_v21, %v309_v32  ;;  %v325_v44 = vrot.slane %v324_v50, 2  ;;  %v522_v46 = vld [vmem:[%s1556_s4 + $0x8] sm:$0xff]  ;;  %v524_v7 = vld [vmem:[%s1556_s4 + $0x18] sm:$0xff]  ;;  %v525_v32 = vld [vmem:[%s1556_s4 + $0x20] sm:$0xff] }
  0x43   :  { %v234_v1 = vrot.slane %v233_v59, 2  ;;  %v247_v26 = vrot.slane %v246_v34, 2  ;;  %v260_v41 = vrot.slane %v259_v35, 2  ;;  %v273_v16 = vrot.slane %v272_v12, 2  ;;  %v529_v20 = vld [vmem:[%s1556_s4 + $0x40] sm:$0xff]  ;;  %v530_v60 = vld [vmem:[%s1556_s4 + $0x48] sm:$0xff] }
  0x44   :  { %v286_v36 = vrot.slane %v285_v37, 2  ;;  %v299_v55 = vrot.slane %v298_v49, 2  ;;  %v312_v30 = vrot.slane %v311_v27, 2  ;;  %v326_v14 = vadd.f32 %v325_v44, %v324_v50 }
  0x45   :  { %v235_v43 = vadd.f32 %v234_v1, %v233_v59  ;;  %v248_v33 = vadd.f32 %v247_v26, %v246_v34  ;;  %v261_v38 = vadd.f32 %v260_v41, %v259_v35  ;;  %v274_v39 = vadd.f32 %v273_v16, %v272_v12  ;;  %v532_v59 = vld [vmem:[%s1556_s4 + $0x58] sm:$0xff]  ;;  %v533_v35 = vld [vmem:[%s1556_s4 + $0x60] sm:$0xff]  ;;  %v534_v12 = vld [vmem:[%s1556_s4 + $0x68] sm:$0xff] }
  0x46   :  { %v287_v25 = vadd.f32 %v286_v36, %v285_v37  ;;  %v300_v45 = vadd.f32 %v299_v55, %v298_v49  ;;  %v313_v47 = vadd.f32 %v312_v30, %v311_v27  ;;  %v327_v56 = vrot.slane %v326_v14, 1  ;;  %v535_v49 = vld [vmem:[%s1556_s4 + $0x70] sm:$0xff]  ;;  %v536_v27 = vld [vmem:[%s1556_s4 + $0x78] sm:$0xff]  ;;  %s824_s4 = smov 32  }
  0x47   :  { %v236_v57 = vrot.slane %v235_v43, 1  ;;  %v249_v11 = vrot.slane %v248_v33, 1  ;;  %v262_v63 = vrot.slane %v261_v38, 1  ;;  %v275_v29 = vrot.slane %v274_v39, 1 }
  0x48   :  { %v288_v10 = vrot.slane %v287_v25, 1  ;;  %v301_v51 = vrot.slane %v300_v45, 1  ;;  %v314_v52 = vrot.slane %v313_v47, 1  ;;  %v1452_v40 = vadd.f32 %v327_v56, %v326_v14 }
  0x49   :  { %v1433_v15 = vadd.f32 %v236_v57, %v235_v43  ;;  %v1435_v19 = vadd.f32 %v249_v11, %v248_v33  ;;  %v1437_v9 = vadd.f32 %v262_v63, %v261_v38  ;;  %v1439_v18 = vadd.f32 %v275_v29, %v274_v39 }
  0x4a   :  { %v1441_v48 = vadd.f32 %v288_v10, %v287_v25  ;;  %v1443_v58 = vadd.f32 %v301_v51, %v300_v45  ;;  %v1448_v8 = vadd.f32 %v314_v52, %v313_v47  ;;  %v792_v42 = vpack.c.bf16 %v522_v46, %v521_v2  ;;  %v662_v2 = vld [vmem:[%s1558_s6] ss:$0 sm:$0xff] }
  0x4b   :  { %v338_v0 = vsel %vm337_vm1, %v1435_v19, %v1433_v15  ;;  %v795_v62 = vpack.c.bf16 %v524_v7, %v523_v54  ;;  %v1665_v31 = vmov 0.0|0.0   ;;  %v798_v23 = vpack.c.bf16 %v526_v4, %v525_v32 }
  0x4c   :  { %v340_v53 = vsel %vm339_vm2, %v1437_v9, %v338_v0  ;;  %793 = vmatpush3.bf16.msra.mxu1 %v792_v42  ;;  %v801_v13 = vpack.c.bf16 %v528_v5, %v527_v28  ;;  %v804_v21 = vpack.c.bf16 %v530_v60, %v529_v20  ;;  %v807_v34 = vpack.c.bf16 %v532_v59, %v531_v22  ;;  %v660_v0 = vld [vmem:[%s1557_s3] ss:$0 sm:$0xff] }
  0x4d   :  { %v342_v24 = vsel %vm341_vm3, %v1439_v18, %v340_v53  ;;  %794 = vmatprep.subr.bf16.mxu1 %v1665_v31  ;;  %v810_v37 = vpack.c.bf16 %v534_v12, %v533_v35  ;;  %v813_v50 = vpack.c.bf16 %v536_v27, %v535_v49 }
  0x4e   :  { %v344_v6 = vsel %vm343_vm4, %v1441_v48, %v342_v24 }
  0x4f   :  { %v346_v17 = vsel %vm345_vm5, %v1443_v58, %v344_v6 }
  0x50   :  { %v348_v3 = vsel %vm347_vm6, %v1448_v8, %v346_v17  ;;  %796 = vmatpush3.bf16.msra.mxu1 %v795_v62 }
  0x51   :  { %v350_v61 = vsel %vm349_vm7, %v1452_v40, %v348_v3  ;;  %797 = vmatprep.subr.bf16.mxu1 %v1665_v31 }
  0x52   :  { %352 = vrot.lane.b32.xlu0 %v350_v61, %s823_s0  ;;  %730 = vmatmul.mubr.f32.vlgmr.msra.gmra.mrb[0].mxu0 %v350_v61 }
  0x54   :  { %799 = vmatpush3.bf16.msra.mxu1 %v798_v23 }
  0x55   :  { %800 = vmatprep.subr.bf16.mxu1 %v1665_v31 }
  0x58   :  { %802 = vmatpush3.bf16.msra.mxu1 %v801_v13 }
  0x59   :  { %803 = vmatprep.subr.bf16.mxu1 %v1665_v31 }
  0x5c   :  { %805 = vmatpush3.bf16.msra.mxu1 %v804_v21 }
  0x5d   :  { %806 = vmatprep.subr.bf16.mxu1 %v1665_v31 }
  0x60   :  { %808 = vmatpush3.bf16.msra.mxu1 %v807_v34 }
  0x61   :  { %809 = vmatprep.subr.bf16.mxu1 %v1665_v31 }
  0x64   :  { %811 = vmatpush3.bf16.msra.mxu1 %v810_v37 }
  0x65   :  { %812 = vmatprep.subr.bf16.mxu1 %v1665_v31 }
  0x68   :  { %814 = vmatpush3.bf16.msra.mxu1 %v813_v50 }
  0xc4   :  { %v353_v1 = vpop.permute.xlu0 %352 }
  0xc5   :  { %v355_v26 = vrot.slane %v353_v1, 1  ;;  %v356_v41 = vrot.slane %v353_v1, 2  ;;  %v357_v16 = vrot.slane %v353_v1, 3  ;;  %v358_v36 = vrot.slane %v353_v1, 4 }
  0xc6   :  { %v359_v55 = vrot.slane %v353_v1, 5  ;;  %v360_v30 = vrot.slane %v353_v1, 6  ;;  %v361_v44 = vrot.slane %v353_v1, 7  ;;  %v370_v43 = vadd.f32 %v353_v1, %v1433_v15 }
  0xc7   :  { %v371_v33 = vadd.f32 %v355_v26, %v1435_v19  ;;  %v372_v38 = vadd.f32 %v356_v41, %v1437_v9  ;;  %v373_v39 = vadd.f32 %v357_v16, %v1439_v18  ;;  %v374_v25 = vadd.f32 %v358_v36, %v1441_v48 }
  0xc8   :  { %v375_v45 = vadd.f32 %v359_v55, %v1443_v58  ;;  %v376_v47 = vadd.f32 %v360_v30, %v1448_v8  ;;  %v377_v14 = vadd.f32 %v361_v44, %v1452_v40 }
  0xc9   :  { %v386_v57 = vrot.slane %v371_v33, 7  ;;  %v388_v11 = vrot.slane %v372_v38, 6  ;;  %v390_v63 = vrot.slane %v373_v39, 5  ;;  %v392_v29 = vrot.slane %v374_v25, 4 }
  0xca   :  { %v394_v51 = vrot.slane %v375_v45, 3  ;;  %v396_v56 = vrot.slane %v376_v47, 2  ;;  %v398_v19 = vrot.slane %v377_v14, 1 }
  0xcb   :  { %v387_v10 = vsel %vm337_vm1, %v386_v57, %v370_v43 }
  0xcc   :  { %v389_v52 = vsel %vm339_vm2, %v388_v11, %v387_v10 }
  0xcd   :  { %v391_v15 = vsel %vm341_vm3, %v390_v63, %v389_v52 }
  0xce   :  { %v393_v9 = vsel %vm343_vm4, %v392_v29, %v391_v15 }
  0xcf   :  { %v395_v18 = vsel %vm345_vm5, %v394_v51, %v393_v9 }
  0xd0   :  { %v397_v48 = vsel %vm347_vm6, %v396_v56, %v395_v18 }
  0xd1   :  { %v399_v58 = vsel %vm349_vm7, %v398_v19, %v397_v48 }
  0xd2   :  { %401 = vrot.lane.b32.xlu0 %v399_v58, %s824_s4 }
 0x125   :  { %v516_v8 = vpop.f32.mrb[0].mxu0 }
 0x126   :  { %v517_v53 = vadd.f32 %v660_v0, %v516_v8  ;;  %v731_v40 = vpop.f32.mrb[1].mxu0 }
 0x128   :  { %v520_v24 = vmax.f32 %v517_v53, 0.0 }
 0x12a   :  { %765 = vmatmul.mubr.f32.vlgmr.msra.gmra.mrb[0].mxu1 %v520_v24 }
 0x144   :  { %v402_v6 = vpop.permute.xlu0 %401 }
 0x145   :  { %v404_v17 = vrot.slane %v402_v6, 1  ;;  %v405_v3 = vrot.slane %v402_v6, 2  ;;  %v406_v46 = vrot.slane %v402_v6, 3  ;;  %v419_v42 = vadd.f32 %v402_v6, %v370_v43 }
 0x146   :  { %v407_v62 = vrot.slane %v402_v6, 4  ;;  %v408_v4 = vrot.slane %v402_v6, 5  ;;  %v409_v20 = vrot.slane %v402_v6, 6  ;;  %v410_v34 = vrot.slane %v402_v6, 7 }
 0x147   :  { %v420_v61 = vadd.f32 %v404_v17, %v371_v33  ;;  %v421_v54 = vadd.f32 %v405_v3, %v372_v38  ;;  %v422_v31 = vadd.f32 %v406_v46, %v373_v39  ;;  %v621_v23 = vmul.f32 %v662_v2, %v419_v42  ;;  %v661_v33 = vld [vmem:[%s1559_s5] ss:$0 sm:$0xff] }
 0x148   :  { %v423_v5 = vadd.f32 %v407_v62, %v374_v25  ;;  %v424_v21 = vadd.f32 %v408_v4, %v375_v45  ;;  %v425_v12 = vadd.f32 %v409_v20, %v376_v47  ;;  %v426_v50 = vadd.f32 %v410_v34, %v377_v14 }
 0x149   :  { %v622_v7 = vmul.f32 %v662_v2, %v420_v61  ;;  %v623_v32 = vmul.f32 %v662_v2, %v421_v54  ;;  %v624_v13 = vmul.f32 %v662_v2, %v422_v31 }
 0x14a   :  { %v625_v59 = vmul.f32 %v662_v2, %v423_v5  ;;  %v626_v49 = vmul.f32 %v662_v2, %v424_v21  ;;  %v627_v26 = vmul.f32 %v662_v2, %v425_v12  ;;  %v628_v36 = vmul.f32 %v662_v2, %v426_v50 }
 0x14b   :  { %v637_v28 = vrot.slane %v622_v7, 7  ;;  %v639_v60 = vrot.slane %v623_v32, 6  ;;  %v641_v35 = vrot.slane %v624_v13, 5 }
 0x14c   :  { %v643_v27 = vrot.slane %v625_v59, 4  ;;  %v645_v41 = vrot.slane %v626_v49, 3  ;;  %v647_v55 = vrot.slane %v627_v26, 2  ;;  %v649_v44 = vrot.slane %v628_v36, 1 }
 0x14d   :  { %v638_v22 = vsel %vm337_vm1, %v637_v28, %v621_v23 }
 0x14e   :  { %v640_v37 = vsel %vm339_vm2, %v639_v60, %v638_v22 }
 0x14f   :  { %v642_v1 = vsel %vm341_vm3, %v641_v35, %v640_v37 }
 0x150   :  { %v644_v16 = vsel %vm343_vm4, %v643_v27, %v642_v1 }
 0x151   :  { %v646_v30 = vsel %vm345_vm5, %v645_v41, %v644_v16 }
 0x152   :  { %v648_v43 = vsel %vm347_vm6, %v647_v55, %v646_v30 }
 0x153   :  { %v650_v38 = vsel %vm349_vm7, %v649_v44, %v648_v43 }
 0x154   :  { %v652_v45 = vadd.f32 %v650_v38, %v517_v53 }
 0x1fd   :  { %v610_v39 = vpop.f32.mrb[0].mxu1 }
 0x1fe   :  { %v611_v25 = vadd.f32 %v661_v33, %v610_v39  ;;  %v766_v47 = vpop.f32.mrb[1].mxu1 }
 0x200   :  { %v653_v14 = vadd.f32 %v652_v45, %v611_v25 }
 0x202   :  { %654 = vst [vmem:[%s1560_s7] sm:$0xff] %v653_v14 }

</bundles_post_ra>
